<compile_context>
chip_gen: v7x
topology: tpu7x:2x2x1
jax: 0.10.0
libtpu: 0.0.40
codegen_flags: <defaults>
</compile_context>

<pallas_src>
import jax
import jax.numpy as jnp
from jax.experimental import pallas as pl
from jax.experimental.pallas import tpu as pltpu


def _round_up(a, m):
    return ((a + m - 1) // m) * m


def _sublane_multiple(dtype):
    """Native sublane tiling multiple for a dtype (f32:8, bf16:16, 8-bit:32)."""
    itemsize = jnp.dtype(dtype).itemsize
    if itemsize >= 4:
        return 8
    if itemsize == 2:
        return 16
    return 32


def _vmem_cap_bytes():
    """Per-TensorCore scoped-VMEM cap with pipelining headroom (v7x has only 64 MiB/TC)."""
    phys = None
    try:
        info = pltpu.get_tpu_info()
        phys = getattr(info, "vmem_capacity_bytes", None)
    except Exception:
        phys = None
    if not phys:
        phys = 64 * 1024 * 1024  # conservative fallback: v7x per-TC VMEM
    return int(min(phys * 0.65, 100 * 1024 * 1024))


# --------------------------------------------------------------------------------------
# Kernels
# --------------------------------------------------------------------------------------
def _linear_relu_single_k_kernel(x_ref, w_ref, b_ref, o_ref):
    """K fits one tile: no accumulator scratch, fuse dot + bias + relu directly."""
    y = jnp.dot(x_ref[...], w_ref[...], preferred_element_type=jnp.float32) + b_ref[...]
    o_ref[...] = jnp.maximum(y, 0.0).astype(o_ref.dtype)


def _linear_relu_multi_k_kernel(x_ref, w_ref, b_ref, o_ref, acc_ref):
    """General case: accumulate over the K grid axis (axis 2) in an f32 VMEM scratch."""
    k = pl.program_id(2)
    nk = pl.num_programs(2)

    @pl.when(k == 0)
    def _init():
        acc_ref[...] = jnp.zeros_like(acc_ref)

    partial = jnp.dot(x_ref[...], w_ref[...], preferred_element_type=jnp.float32)

    @pl.when(k < nk - 1)
    def _accumulate():
        acc_ref[...] += partial

    @pl.when(k == nk - 1)
    def _finalize():
        # Use the fresh dot result directly (no acc store + reload on the last step).
        y = acc_ref[...] + partial + b_ref[...]
        o_ref[...] = jnp.maximum(y, 0.0).astype(o_ref.dtype)


# --------------------------------------------------------------------------------------
# Wrapper
# --------------------------------------------------------------------------------------
def prepare_linear_params(w, b, *, compute_dtype="auto", tn_max=1024, tk_max=512):
    """Hoisted, call-invariant weight prep: transpose + pad + cast ONCE per layer.

    w: (N, K) torch nn.Linear layout; b: (N,).
    compute_dtype="auto" -> bf16 when weights are f32 (native MXU fast path).
    """
    N, K = w.shape
    assert b.shape == (N,)
    if compute_dtype == "auto":
        cdt = jnp.dtype(jnp.bfloat16) if jnp.dtype(w.dtype) == jnp.float32 else jnp.dtype(w.dtype)
    else:
        cdt = jnp.dtype(compute_dtype)

    tk = min(tk_max, _round_up(K, 128))
    tn = min(tn_max, _round_up(N, 128))
    Kp, Np = _round_up(K, tk), _round_up(N, tn)

    wp = jnp.pad(w.T, ((0, Kp - K), (0, Np - N))).astype(cdt)        # (Kp, Np)
    bp = jnp.pad(b, (0, Np - N)).reshape(1, Np).astype(jnp.float32)  # (1, Np)
    return dict(wp=wp, bp=bp, N=N, K=K, tn=tn, tk=tk, compute_dtype=cdt)


def linear_relu_prepared(x, params, *, tm_max=512, force_pallas=False):
    """relu(x @ W^T + b) using pre-prepared (padded/cast) weights."""
    M, K = x.shape
    assert K == params["K"]
    N = params["N"]
    wp, bp = params["wp"], params["bp"]
    tk, tn, cdt = params["tk"], params["tn"], params["compute_dtype"]
    Kp, Np = wp.shape
    out_dtype = x.dtype

    # Tiny problems: pad copies + launch overhead dominate and the matmul uses <1% of the
    # MXU; plain XLA dot is faster.
    if not force_pallas and (2 * M * K * N) < (1 << 21):
        y = jnp.dot(x.astype(cdt), wp[:K, :N], preferred_element_type=jnp.float32) + bp[0, :N]
        return jnp.maximum(y, 0.0).astype(out_dtype)

    # dtype-aware M rounding (bf16 packs 2 rows/sublane -> 16-row minimum tiles).
    m_mult = max(_sublane_multiple(cdt), _sublane_multiple(out_dtype))
    tm = min(tm_max, _round_up(M, m_mult))
    Mp = _round_up(M, tm)
    xp = jnp.pad(x, ((0, Mp - M), (0, Kp - K))).astype(cdt)

    grid = (Mp // tm, Np // tn, Kp // tk)
    multi_k = grid[2] > 1
    gemv_like = grid[0] == 1  # small M -> weight-stream (HBM) bound

    isz = jnp.dtype(cdt).itemsize
    osz = jnp.dtype(out_dtype).itemsize
    w_bufs = 3 if (gemv_like and multi_k) else 2
    tile_bytes = (2 * tm * tk * isz                 # x (double buffered)
                  + w_bufs * tk * tn * isz          # weights
                  + 2 * tn * 4                      # bias
                  + 2 * tm * tn * osz               # output
                  + (tm * tn * 4 if multi_k else 0))  # f32 accumulator scratch
    vmem_limit = int(min(max(tile_bytes + (8 << 20), 32 << 20), _vmem_cap_bytes()))

    cost = pl.CostEstimate(
        flops=2 * Mp * Kp * Np,
        bytes_accessed=isz * (Mp * Kp * grid[1] + Kp * Np * grid[0]) + 4 * Np + osz * Mp * Np,
        transcendentals=0,
    )

    def build(deep_w):
        w_idx = lambda i, j, k: (k, j)
        if deep_w:
            w_spec = pl.BlockSpec((tk, tn), w_idx, pipeline_mode=pl.Buffered(3))
        else:
            w_spec = pl.BlockSpec((tk, tn), w_idx)
        in_specs = [
            pl.BlockSpec((tm, tk), lambda i, j, k: (i, k)),   # x tile
            w_spec,                                           # weight tile
            pl.BlockSpec((1, tn), lambda i, j, k: (0, j)),    # bias tile
        ]
        out_spec = pl.BlockSpec((tm, tn), lambda i, j, k: (i, j))
        kernel = _linear_relu_multi_k_kernel if multi_k else _linear_relu_single_k_kernel
        scratch = [pltpu.VMEM((tm, tn), jnp.float32)] if multi_k else []
        return pl.pallas_call(
            kernel,
            out_shape=jax.ShapeDtypeStruct((Mp, Np), out_dtype),
            grid_spec=pltpu.PrefetchScalarGridSpec(
                num_scalar_prefetch=0,
                grid=grid,
                in_specs=in_specs,
                out_specs=out_spec,
                scratch_shapes=scratch,
            ),
            compiler_params=pltpu.CompilerParams(
                dimension_semantics=("parallel", "parallel", "arbitrary"),
                vmem_limit_bytes=vmem_limit,
            ),
            cost_estimate=cost,
        )

    try:
        out_p = build(deep_w=(gemv_like and multi_k))(xp, wp, bp)
    except Exception:
        # Fall back to the default double buffer if deep weight buffering is unavailable.
        out_p = build(deep_w=False)(xp, wp, bp)

    return out_p[:M, :N]


def linear_relu(x, w, b, *, compute_dtype="auto", tm_max=512, tn_max=1024,
                tk_max=512, force_pallas=False):
    """relu(x @ w.T + b). x: (M, K); w: (N, K) torch nn.Linear layout; b: (N,).

    For repeated calls with the same layer, prefer prepare_linear_params() +
    linear_relu_prepared() so the weight transpose/pad/cast is not repeated.
    """
    params = prepare_linear_params(w, b, compute_dtype=compute_dtype,
                                   tn_max=tn_max, tk_max=tk_max)
    return linear_relu_prepared(x, params, tm_max=tm_max, force_pallas=force_pallas)


if __name__ == "__main__":
    key = jax.random.PRNGKey(0)
    k_x, k_w, k_b, k_x2, k_w2, k_b2 = jax.random.split(key, 6)

    # --- MyNetworkBlock(in_dim=32, out_dim=32), batch=8: spec-sized demo ---
    batch, in_dim, out_dim = 8, 32, 32
    x = jax.random.normal(k_x, (batch, in_dim), dtype=jnp.float32)
    bound = 1.0 / (in_dim ** 0.5)  # torch.nn.Linear-style uniform init
    w = jax.random.uniform(k_w, (out_dim, in_dim), minval=-bound, maxval=bound,
                           dtype=jnp.float32)  # torch layout (out_dim, in_dim)
    b = jax.random.uniform(k_b, (out_dim,), minval=-bound, maxval=bound, dtype=jnp.float32)
    ref = jnp.maximum(x @ w.T + b, 0.0)

    # Exact f32 path through the Pallas kernel (single-K specialization).
    out_f32 = jax.block_until_ready(
        linear_relu(x, w, b, compute_dtype=jnp.float32, force_pallas=True))
    assert out_f32.shape == (batch, out_dim)
    assert jnp.allclose(out_f32, ref, atol=1e-5, rtol=1e-5)

    # Default bf16 MXU fast path (f32 accumulation), forced through Pallas.
    out_bf16 = jax.block_until_ready(linear_relu(x, w, b, force_pallas=True))
    assert out_bf16.shape == (batch, out_dim)
    assert jnp.allclose(out_bf16, ref, atol=3e-2, rtol=3e-2)

    # Auto path: a problem this tiny bypasses Pallas (overhead-dominated) — still correct.
    out_auto = jax.block_until_ready(linear_relu(x, w, b))
    assert jnp.allclose(out_auto, ref, atol=3e-2, rtol=3e-2)

    # --- Moderate shape exercising the multi-K accumulator kernel + hoisted weight prep ---
    M2, K2, N2 = 64, 1100, 384
    x2 = jax.random.normal(k_x2, (M2, K2), dtype=jnp.float32)
    bound2 = 1.0 / (K2 ** 0.5)
    w2 = jax.random.uniform(k_w2, (N2, K2), minval=-bound2, maxval=bound2, dtype=jnp.float32)
    b2 = jax.random.uniform(k_b2, (N2,), minval=-bound2, maxval=bound2, dtype=jnp.float32)

    params2 = prepare_linear_params(w2, b2)  # transpose/pad/cast once (call-invariant)
    out2 = jax.block_until_ready(linear_relu_prepared(x2, params2, force_pallas=True))
    ref2 = jnp.maximum(x2 @ w2.T + b2, 0.0)
    assert out2.shape == (M2, N2)
    assert jnp.allclose(out2, ref2, atol=5e-2, rtol=5e-2)

    print("KERNEL_OK")
</pallas_src>

<mosaic_0001>
module attributes {stable_mosaic.version = 11 : i64} {
  func.func @_linear_relu_single_k_kernel(%arg0: i32, %arg1: i32, %arg2: i32, %arg3: memref<8x128xf32, #tpu.memory_space<vmem>>, %arg4: memref<128x128xf32, #tpu.memory_space<vmem>>, %arg5: memref<1x128xf32, #tpu.memory_space<vmem>>, %arg6: memref<8x128xf32, #tpu.memory_space<vmem>>) attributes {dimension_semantics = [#tpu.dimension_semantics<parallel>, #tpu.dimension_semantics<parallel>, #tpu.dimension_semantics<arbitrary>], iteration_bounds = array<i64: 1, 1, 1>, scalar_prefetch = 0 : i64, scratch_operands = 0 : i64, tpu.core_type = #tpu.core_type<tc>, window_params = [{transform_indices = @transform_0, window_bounds = array<i64: 8, 128>}, {transform_indices = @transform_1, window_bounds = array<i64: 128, 128>}, {transform_indices = @transform_2, window_bounds = array<i64: 1, 128>}, {transform_indices = @transform_3, window_bounds = array<i64: 8, 128>}]} {
    %c0 = arith.constant 0 : index
    %c0_0 = arith.constant 0 : index
    %0 = vector.load %arg3[%c0, %c0_0] : memref<8x128xf32, #tpu.memory_space<vmem>>, vector<8x128xf32>
    %c0_1 = arith.constant 0 : index
    %c0_2 = arith.constant 0 : index
    %1 = vector.load %arg4[%c0_1, %c0_2] : memref<128x128xf32, #tpu.memory_space<vmem>>, vector<128x128xf32>
    %cst = arith.constant dense<0.000000e+00> : vector<8x128xf32>
    %2 = tpu.matmul %0, %1, %cst {dimension_numbers = #tpu.dot_dimension_numbers<[1], [0], [0], [1], [0, 0, 1, 1], [], []>} : vector<8x128xf32>, vector<128x128xf32>, vector<8x128xf32> -> vector<8x128xf32>
    %c0_3 = arith.constant 0 : index
    %c0_4 = arith.constant 0 : index
    %3 = vector.load %arg5[%c0_3, %c0_4] : memref<1x128xf32, #tpu.memory_space<vmem>>, vector<1x128xf32>
    %4 = vector.broadcast %3 : vector<1x128xf32> to vector<8x128xf32>
    %5 = arith.addf %2, %4 : vector<8x128xf32>
    %cst_5 = arith.constant 0.000000e+00 : f32
    %6 = vector.broadcast %cst_5 : f32 to vector<8x128xf32>
    %7 = arith.maximumf %5, %6 : vector<8x128xf32>
    %c0_6 = arith.constant 0 : index
    %c0_7 = arith.constant 0 : index
    %8 = vector.load %arg6[%c0_6, %c0_7] : memref<8x128xf32, #tpu.memory_space<vmem>>, vector<8x128xf32>
    tpu.vector_store %arg6[%c0_6, %c0_7], %7 {strides = array<i32>} : memref<8x128xf32, #tpu.memory_space<vmem>>, vector<8x128xf32>,
    return
  }
  func.func @transform_0(%arg0: i32, %arg1: i32, %arg2: i32) -> (i32, i32) {
    %c0_i32 = arith.constant 0 : i32
    return %arg0, %arg2 : i32, i32
  }
  func.func @transform_1(%arg0: i32, %arg1: i32, %arg2: i32) -> (i32, i32) {
    %c0_i32 = arith.constant 0 : i32
    return %arg2, %arg1 : i32, i32
  }
  func.func @transform_2(%arg0: i32, %arg1: i32, %arg2: i32) -> (i32, i32) {
    %c0_i32 = arith.constant 0 : i32
    %c0_i32_0 = arith.constant 0 : i32
    return %c0_i32, %arg1 : i32, i32
  }
  func.func @transform_3(%arg0: i32, %arg1: i32, %arg2: i32) -> (i32, i32) {
    %c0_i32 = arith.constant 0 : i32
    return %arg0, %arg1 : i32, i32
  }
}

module attributes {stable_mosaic.version = 11 : i64} {
  func.func @_linear_relu_single_k_kernel(%arg0: i32, %arg1: i32, %arg2: i32, %arg3: memref<8x128xf32, #tpu.memory_space<vmem>>, %arg4: memref<128x128xf32, #tpu.memory_space<vmem>>, %arg5: memref<1x128xf32, #tpu.memory_space<vmem>>, %arg6: memref<8x128xf32, #tpu.memory_space<vmem>>) attributes {dimension_semantics = [#tpu.dimension_semantics<parallel>, #tpu.dimension_semantics<parallel>, #tpu.dimension_semantics<arbitrary>], iteration_bounds = array<i64: 1, 1, 1>, scalar_prefetch = 0 : i64, scratch_operands = 0 : i64, tpu.core_type = #tpu.core_type<tc>, window_params = [{transform_indices = @transform_0, window_bounds = array<i64: 8, 128>}, {transform_indices = @transform_1, window_bounds = array<i64: 128, 128>}, {transform_indices = @transform_2, window_bounds = array<i64: 1, 128>}, {transform_indices = @transform_3, window_bounds = array<i64: 8, 128>}]} {
    %c0 = arith.constant 0 : index
    %c0_0 = arith.constant 0 : index
    %0 = vector.load %arg3[%c0, %c0_0] : memref<8x128xf32, #tpu.memory_space<vmem>>, vector<8x128xf32>
    %c0_1 = arith.constant 0 : index
    %c0_2 = arith.constant 0 : index
    %1 = vector.load %arg4[%c0_1, %c0_2] : memref<128x128xf32, #tpu.memory_space<vmem>>, vector<128x128xf32>
    %cst = arith.constant dense<0.000000e+00> : vector<8x128xf32>
    %2 = tpu.matmul %0, %1, %cst {dimension_numbers = #tpu.dot_dimension_numbers<[1], [0], [0], [1], [0, 0, 1, 1], [], []>} : vector<8x128xf32>, vector<128x128xf32>, vector<8x128xf32> -> vector<8x128xf32>
    %c0_3 = arith.constant 0 : index
    %c0_4 = arith.constant 0 : index
    %3 = vector.load %arg5[%c0_3, %c0_4] : memref<1x128xf32, #tpu.memory_space<vmem>>, vector<1x128xf32>
    %4 = vector.broadcast %3 : vector<1x128xf32> to vector<8x128xf32>
    %5 = arith.addf %2, %4 : vector<8x128xf32>
    %cst_5 = arith.constant 0.000000e+00 : f32
    %6 = vector.broadcast %cst_5 : f32 to vector<8x128xf32>
    %7 = arith.maximumf %5, %6 : vector<8x128xf32>
    %c0_6 = arith.constant 0 : index
    %c0_7 = arith.constant 0 : index
    %8 = vector.load %arg6[%c0_6, %c0_7] : memref<8x128xf32, #tpu.memory_space<vmem>>, vector<8x128xf32>
    tpu.vector_store %arg6[%c0_6, %c0_7], %7 {strides = array<i32>} : memref<8x128xf32, #tpu.memory_space<vmem>>, vector<8x128xf32>,
    return
  }
  func.func @transform_0(%arg0: i32, %arg1: i32, %arg2: i32) -> (i32, i32) {
    %c0_i32 = arith.constant 0 : i32
    return %arg0, %arg2 : i32, i32
  }
  func.func @transform_1(%arg0: i32, %arg1: i32, %arg2: i32) -> (i32, i32) {
    %c0_i32 = arith.constant 0 : i32
    return %arg2, %arg1 : i32, i32
  }
  func.func @transform_2(%arg0: i32, %arg1: i32, %arg2: i32) -> (i32, i32) {
    %c0_i32 = arith.constant 0 : i32
    %c0_i32_0 = arith.constant 0 : i32
    return %c0_i32, %arg1 : i32, i32
  }
  func.func @transform_3(%arg0: i32, %arg1: i32, %arg2: i32) -> (i32, i32) {
    %c0_i32 = arith.constant 0 : i32
    return %arg0, %arg1 : i32, i32
  }
}

</mosaic_0001>

<bundles_post_ra>
// kernel: tpu_custom_call.1
= control target key start
LH: loop header
LB: loop body
LE: loop exit
PB: predicated region body
PF: predicated region fallthrough
CT: control target
= control target key end

     0   :  { %8 = vsyncpa [#allocation3], 0  ;;  %s384_s0 = inlined_call_operand.hbm [shape: f32[8,128], index: 0, kind: input, shape index: {}]   ;;  %s385_s1 = inlined_call_operand.hbm [shape: f32[128,128], index: 1, kind: input, shape index: {}]   ;;  %s386_s2 = inlined_call_operand.vmem [shape: f32[1,128], index: 2, kind: input, shape index: {}]   ;;  %s387_s3 = inlined_call_operand.hbm [shape: f32[8,128], index: 3, kind: output, shape index: {}]  }
   0x1   :  { %9 = vsyncpa [#allocation6], 0 }
   0x2   :  { %10 = vsyncpa [#allocation4], 0  ;;  %s310_s12 = smov [#allocation2]   ;;  %s311_s14 = smov [#allocation5]  }
   0x3   :  { %s17_s13 = sshll.u32 %s310_s12, 4  ;;  %s26_s15 = sshll.u32 %s311_s14, 4  ;;  %s18_s13 = int_to_ptr.vmem [resolvable:$true] %s17_s13  ;;  %s338_s15 = int_to_ptr.vmem [resolvable:$true] %s26_s15 }
   0x4   :  { %s238_s18 = scalar_lea.hbm %s384_s0, 128 }
   0x5   :  { %p239_p0 = scmp.ne.s32.totalorder %s384_s0, %s238_s18  ;;  %p242_p1 = scmp.lt.u32.totalorder %s238_s18, %s384_s0 }
   0x7   :  { %p244_p2 = pnand %p242_p1, %p239_p0 }
   0x9   :  { %247 = shalt.err (!%p244_p2)
}
   0xa   :  { %s248_s23 = scalar_lea.vmem %s18_s13, 128  ;;  %p253_p4 = scmp.lt.s32.totalorder %s18_s13, %s18_s13 }
   0xb   :  { %p249_p3 = scmp.ne.s32.totalorder %s18_s13, %s248_s23  ;;  %p254_p5 = scmp.lt.s32.totalorder %s248_s23, %s248_s23 }
   0xd   :  { %p255_p6 = por %p254_p5, %p253_p4 }
   0xf   :  { %p256_p7 = pnand %p255_p6, %p249_p3 }
  0x11   :  { %259 = shalt.err (!%p256_p7)
}
  0x12   :  { %20 = dma.hbm_to_vmem [thread:$0]  %s384_s0, 128, %s18_s13, [#allocation3]  }
  0x13   :  { %s260_s28 = scalar_lea.hbm %s385_s1, 2048 }
  0x14   :  { %p261_p8 = scmp.ne.s32.totalorder %s385_s1, %s260_s28  ;;  %p264_p9 = scmp.lt.u32.totalorder %s260_s28, %s385_s1 }
  0x16   :  { %p266_p10 = pnand %p264_p9, %p261_p8 }
  0x18   :  { %269 = shalt.err (!%p266_p10)
}
  0x19   :  { %s270_s6 = scalar_lea.vmem %s338_s15, 2048  ;;  %p275_p12 = scmp.lt.s32.totalorder %s338_s15, %s338_s15 }
  0x1a   :  { %p271_p11 = scmp.ne.s32.totalorder %s338_s15, %s270_s6  ;;  %p276_p13 = scmp.lt.s32.totalorder %s270_s6, %s270_s6 }
  0x1c   :  { %p277_p0 = por %p276_p13, %p275_p12 }
  0x1e   :  { %p278_p1 = pnand %p277_p0, %p271_p11 }
  0x20   :  { %281 = shalt.err (!%p278_p1)
}
  0x21   :  { %s312_s0 = smov 128   ;;  %s313_s7 = smov 8  }
  0x22   :  { %32 = dma.hbm_to_vmem [thread:$0]  %s385_s1, 2048, %s338_s15, [#allocation6], %s312_s0, %s312_s0, %s313_s7  }
  0x23   :  { %304 = dma.done.wait [#allocation3], 128  }
  0x24   :  { %305 = vsyncadd [#allocation3], 4294967168 }
  0x25   :  { %306 = dma.done.wait [#allocation6], 2048  }
  0x26   :  { %307 = vsyncadd [#allocation6], 4294965248  ;;  %v314_v0 = vmov 0.0|0.0   ;;  %vm315_vm0 = vmmov 0   ;;  %v316_v1 = vmov 0.0   ;;  %v42_v2 = vld [vmem:[#allocation5] sm:$0xff] }
  0x27   :  { %206 = vmatprep.subr.bf16.mxu0 %v314_v0  ;;  %203 = vmatprep.mubr.msk.f32.mxu0 %vm315_vm0, %v316_v1  ;;  %v43_v3 = vld [vmem:[#allocation5 + $0x8] sm:$0xff]  ;;  %v44_v4 = vld [vmem:[#allocation5 + $0x10] sm:$0xff]  ;;  %v45_v6 = vld [vmem:[#allocation5 + $0x18] sm:$0xff]  ;;  %s317_s11 = smov [#allocation7]  }
  0x28   :  { %v207_v5 = vpack.c.bf16 %v43_v3, %v42_v2  ;;  %v210_v7 = vpack.c.bf16 %v45_v6, %v44_v4  ;;  %v46_v8 = vld [vmem:[#allocation5 + $0x20] sm:$0xff]  ;;  %v47_v9 = vld [vmem:[#allocation5 + $0x28] sm:$0xff]  ;;  %v48_v11 = vld [vmem:[#allocation5 + $0x30] sm:$0xff]  ;;  %s143_s12 = sshll.u32 %s317_s11, 4  ;;  %s144_s12 = int_to_ptr.vmem [resolvable:$true] %s143_s12 }
  0x29   :  { %v213_v10 = vpack.c.bf16 %v47_v9, %v46_v8  ;;  %v49_v12 = vld [vmem:[#allocation5 + $0x38] sm:$0xff]  ;;  %v50_v14 = vld [vmem:[#allocation5 + $0x40] sm:$0xff]  ;;  %v51_v15 = vld [vmem:[#allocation5 + $0x48] sm:$0xff]  ;;  %s282_s13 = scalar_lea.vmem %s144_s12, 128  ;;  %p287_p3 = scmp.lt.s32.totalorder %s144_s12, %s144_s12 }
  0x2a   :  { %208 = vmatpush3.bf16.msra.mxu0 %v207_v5  ;;  %v216_v13 = vpack.c.bf16 %v49_v12, %v48_v11  ;;  %v219_v16 = vpack.c.bf16 %v51_v15, %v50_v14  ;;  %v52_v17 = vld [vmem:[#allocation5 + $0x50] sm:$0xff]  ;;  %v53_v18 = vld [vmem:[#allocation5 + $0x58] sm:$0xff]  ;;  %v54_v20 = vld [vmem:[#allocation5 + $0x60] sm:$0xff]  ;;  %p283_p2 = scmp.ne.s32.totalorder %s144_s12, %s282_s13  ;;  %p288_p4 = scmp.lt.s32.totalorder %s282_s13, %s282_s13 }
  0x2b   :  { %209 = vmatprep.subr.bf16.mxu0 %v314_v0  ;;  %v222_v19 = vpack.c.bf16 %v53_v18, %v52_v17  ;;  %v55_v21 = vld [vmem:[#allocation5 + $0x68] sm:$0xff]  ;;  %v56_v23 = vld [vmem:[#allocation5 + $0x70] sm:$0xff]  ;;  %v57_v24 = vld [vmem:[#allocation5 + $0x78] sm:$0xff] }
  0x2c   :  { %v225_v22 = vpack.c.bf16 %v55_v21, %v54_v20  ;;  %v228_v25 = vpack.c.bf16 %v57_v24, %v56_v23  ;;  %v41_v26 = vld [vmem:[#allocation2] sm:$0xff]  ;;  %p289_p5 = por %p288_p4, %p287_p3 }
  0x2d   :  { %v153_v27 = vld [vmem:[%s386_s2] ss:$0 sm:$0xff] }
  0x2e   :  { %211 = vmatpush3.bf16.msra.mxu0 %v210_v7  ;;  %p290_p6 = pnand %p289_p5, %p283_p2 }
  0x2f   :  { %212 = vmatprep.subr.bf16.mxu0 %v314_v0 }
  0x32   :  { %214 = vmatpush3.bf16.msra.mxu0 %v213_v10 }
  0x33   :  { %215 = vmatprep.subr.bf16.mxu0 %v314_v0 }
  0x36   :  { %217 = vmatpush3.bf16.msra.mxu0 %v216_v13 }
  0x37   :  { %218 = vmatprep.subr.bf16.mxu0 %v314_v0 }
  0x3a   :  { %220 = vmatpush3.bf16.msra.mxu0 %v219_v16 }
  0x3b   :  { %221 = vmatprep.subr.bf16.mxu0 %v314_v0 }
  0x3e   :  { %223 = vmatpush3.bf16.msra.mxu0 %v222_v19 }
  0x3f   :  { %224 = vmatprep.subr.bf16.mxu0 %v314_v0 }
  0x42   :  { %226 = vmatpush3.bf16.msra.mxu0 %v225_v22 }
  0x43   :  { %227 = vmatprep.subr.bf16.mxu0 %v314_v0 }
  0x46   :  { %229 = vmatpush3.bf16.msra.mxu0 %v228_v25 }
  0x49   :  { %204 = vmatmul.mubr.f32.vlgmr.msra.gmra.mrb[0].mxu0 %v41_v26 }
 0x11c   :  { %v131_v28 = vpop.f32.mrb[0].mxu0 }
 0x11d   :  { %v132_v29 = vadd.f32 %v153_v27, %v131_v28  ;;  %v205_v30 = vpop.f32.mrb[1].mxu0 }
 0x11f   :  { %v135_v31 = vmax.f32 %v132_v29, 0.0 }
 0x121   :  { %136 = vst [vmem:[#allocation7] sm:$0xff] %v135_v31 }
 0x122   :  { %293 = shalt.err (!%p290_p6)
}
 0x123   :  { %s294_s16 = scalar_lea.hbm %s387_s3, 128 }
 0x124   :  { %p295_p7 = scmp.ne.s32.totalorder %s387_s3, %s294_s16  ;;  %p298_p8 = scmp.lt.u32.totalorder %s294_s16, %s387_s3 }
 0x126   :  { %p300_p9 = pnand %p298_p8, %p295_p7 }
 0x128   :  { %303 = shalt.err (!%p300_p9)
}
 0x129   :  { %146 = dma.vmem_to_hbm [thread:$0]  %s144_s12, 128, %s387_s3, [#allocation4]  }
 0x12a   :  { %308 = dma.done.wait [#allocation4], 128  }
 0x12b   :  { %309 = vsyncadd [#allocation4], 4294967168 }
 0x12c   :  { %150 = vsyncpa [#allocation3], 1 }
 0x12d   :  { %151 = vsyncpa [#allocation6], 1 }
 0x12e   :  { %152 = vsyncpa [#allocation4], 1 }

// kernel: tpu_custom_call.1
= control target key start
LH: loop header
LB: loop body
LE: loop exit
PB: predicated region body
PF: predicated region fallthrough
CT: control target
= control target key end

     0   :  { %8 = vsyncpa [#allocation3], 0  ;;  %s384_s0 = inlined_call_operand.hbm [shape: f32[8,128], index: 0, kind: input, shape index: {}]   ;;  %s385_s1 = inlined_call_operand.hbm [shape: f32[128,128], index: 1, kind: input, shape index: {}]   ;;  %s386_s2 = inlined_call_operand.vmem [shape: f32[1,128], index: 2, kind: input, shape index: {}]   ;;  %s387_s3 = inlined_call_operand.hbm [shape: f32[8,128], index: 3, kind: output, shape index: {}]  }
   0x1   :  { %9 = vsyncpa [#allocation6], 0 }
   0x2   :  { %10 = vsyncpa [#allocation4], 0  ;;  %s310_s12 = smov [#allocation2]   ;;  %s311_s14 = smov [#allocation5]  }
   0x3   :  { %s17_s13 = sshll.u32 %s310_s12, 4  ;;  %s26_s15 = sshll.u32 %s311_s14, 4  ;;  %s18_s13 = int_to_ptr.vmem [resolvable:$true] %s17_s13  ;;  %s338_s15 = int_to_ptr.vmem [resolvable:$true] %s26_s15 }
   0x4   :  { %s238_s18 = scalar_lea.hbm %s384_s0, 128 }
   0x5   :  { %p239_p0 = scmp.ne.s32.totalorder %s384_s0, %s238_s18  ;;  %p242_p1 = scmp.lt.u32.totalorder %s238_s18, %s384_s0 }
   0x7   :  { %p244_p2 = pnand %p242_p1, %p239_p0 }
   0x9   :  { %247 = shalt.err (!%p244_p2)
}
   0xa   :  { %s248_s23 = scalar_lea.vmem %s18_s13, 128  ;;  %p253_p4 = scmp.lt.s32.totalorder %s18_s13, %s18_s13 }
   0xb   :  { %p249_p3 = scmp.ne.s32.totalorder %s18_s13, %s248_s23  ;;  %p254_p5 = scmp.lt.s32.totalorder %s248_s23, %s248_s23 }
   0xd   :  { %p255_p6 = por %p254_p5, %p253_p4 }
   0xf   :  { %p256_p7 = pnand %p255_p6, %p249_p3 }
  0x11   :  { %259 = shalt.err (!%p256_p7)
}
  0x12   :  { %20 = dma.hbm_to_vmem [thread:$0]  %s384_s0, 128, %s18_s13, [#allocation3]  }
  0x13   :  { %s260_s28 = scalar_lea.hbm %s385_s1, 2048 }
  0x14   :  { %p261_p8 = scmp.ne.s32.totalorder %s385_s1, %s260_s28  ;;  %p264_p9 = scmp.lt.u32.totalorder %s260_s28, %s385_s1 }
  0x16   :  { %p266_p10 = pnand %p264_p9, %p261_p8 }
  0x18   :  { %269 = shalt.err (!%p266_p10)
}
  0x19   :  { %s270_s6 = scalar_lea.vmem %s338_s15, 2048  ;;  %p275_p12 = scmp.lt.s32.totalorder %s338_s15, %s338_s15 }
  0x1a   :  { %p271_p11 = scmp.ne.s32.totalorder %s338_s15, %s270_s6  ;;  %p276_p13 = scmp.lt.s32.totalorder %s270_s6, %s270_s6 }
  0x1c   :  { %p277_p0 = por %p276_p13, %p275_p12 }
  0x1e   :  { %p278_p1 = pnand %p277_p0, %p271_p11 }
  0x20   :  { %281 = shalt.err (!%p278_p1)
}
  0x21   :  { %s312_s0 = smov 128   ;;  %s313_s7 = smov 8  }
  0x22   :  { %32 = dma.hbm_to_vmem [thread:$0]  %s385_s1, 2048, %s338_s15, [#allocation6], %s312_s0, %s312_s0, %s313_s7  }
  0x23   :  { %304 = dma.done.wait [#allocation3], 128  }
  0x24   :  { %305 = vsyncadd [#allocation3], 4294967168 }
  0x25   :  { %306 = dma.done.wait [#allocation6], 2048  }
  0x26   :  { %307 = vsyncadd [#allocation6], 4294965248  ;;  %v314_v0 = vmov 0.0|0.0   ;;  %vm315_vm0 = vmmov 0   ;;  %v316_v1 = vmov 0.0   ;;  %v42_v2 = vld [vmem:[#allocation5] sm:$0xff] }
  0x27   :  { %206 = vmatprep.subr.bf16.mxu0 %v314_v0  ;;  %203 = vmatprep.mubr.msk.f32.mxu0 %vm315_vm0, %v316_v1  ;;  %v43_v3 = vld [vmem:[#allocation5 + $0x8] sm:$0xff]  ;;  %v44_v4 = vld [vmem:[#allocation5 + $0x10] sm:$0xff]  ;;  %v45_v6 = vld [vmem:[#allocation5 + $0x18] sm:$0xff]  ;;  %s317_s11 = smov [#allocation7]  }
  0x28   :  { %v207_v5 = vpack.c.bf16 %v43_v3, %v42_v2  ;;  %v210_v7 = vpack.c.bf16 %v45_v6, %v44_v4  ;;  %v46_v8 = vld [vmem:[#allocation5 + $0x20] sm:$0xff]  ;;  %v47_v9 = vld [vmem:[#allocation5 + $0x28] sm:$0xff]  ;;  %v48_v11 = vld [vmem:[#allocation5 + $0x30] sm:$0xff]  ;;  %s143_s12 = sshll.u32 %s317_s11, 4  ;;  %s144_s12 = int_to_ptr.vmem [resolvable:$true] %s143_s12 }
  0x29   :  { %v213_v10 = vpack.c.bf16 %v47_v9, %v46_v8  ;;  %v49_v12 = vld [vmem:[#allocation5 + $0x38] sm:$0xff]  ;;  %v50_v14 = vld [vmem:[#allocation5 + $0x40] sm:$0xff]  ;;  %v51_v15 = vld [vmem:[#allocation5 + $0x48] sm:$0xff]  ;;  %s282_s13 = scalar_lea.vmem %s144_s12, 128  ;;  %p287_p3 = scmp.lt.s32.totalorder %s144_s12, %s144_s12 }
  0x2a   :  { %208 = vmatpush3.bf16.msra.mxu0 %v207_v5  ;;  %v216_v13 = vpack.c.bf16 %v49_v12, %v48_v11  ;;  %v219_v16 = vpack.c.bf16 %v51_v15, %v50_v14  ;;  %v52_v17 = vld [vmem:[#allocation5 + $0x50] sm:$0xff]  ;;  %v53_v18 = vld [vmem:[#allocation5 + $0x58] sm:$0xff]  ;;  %v54_v20 = vld [vmem:[#allocation5 + $0x60] sm:$0xff]  ;;  %p283_p2 = scmp.ne.s32.totalorder %s144_s12, %s282_s13  ;;  %p288_p4 = scmp.lt.s32.totalorder %s282_s13, %s282_s13 }
  0x2b   :  { %209 = vmatprep.subr.bf16.mxu0 %v314_v0  ;;  %v222_v19 = vpack.c.bf16 %v53_v18, %v52_v17  ;;  %v55_v21 = vld [vmem:[#allocation5 + $0x68] sm:$0xff]  ;;  %v56_v23 = vld [vmem:[#allocation5 + $0x70] sm:$0xff]  ;;  %v57_v24 = vld [vmem:[#allocation5 + $0x78] sm:$0xff] }
  0x2c   :  { %v225_v22 = vpack.c.bf16 %v55_v21, %v54_v20  ;;  %v228_v25 = vpack.c.bf16 %v57_v24, %v56_v23  ;;  %v41_v26 = vld [vmem:[#allocation2] sm:$0xff]  ;;  %p289_p5 = por %p288_p4, %p287_p3 }
  0x2d   :  { %v153_v27 = vld [vmem:[%s386_s2] ss:$0 sm:$0xff] }
  0x2e   :  { %211 = vmatpush3.bf16.msra.mxu0 %v210_v7  ;;  %p290_p6 = pnand %p289_p5, %p283_p2 }
  0x2f   :  { %212 = vmatprep.subr.bf16.mxu0 %v314_v0 }
  0x32   :  { %214 = vmatpush3.bf16.msra.mxu0 %v213_v10 }
  0x33   :  { %215 = vmatprep.subr.bf16.mxu0 %v314_v0 }
  0x36   :  { %217 = vmatpush3.bf16.msra.mxu0 %v216_v13 }
  0x37   :  { %218 = vmatprep.subr.bf16.mxu0 %v314_v0 }
  0x3a   :  { %220 = vmatpush3.bf16.msra.mxu0 %v219_v16 }
  0x3b   :  { %221 = vmatprep.subr.bf16.mxu0 %v314_v0 }
  0x3e   :  { %223 = vmatpush3.bf16.msra.mxu0 %v222_v19 }
  0x3f   :  { %224 = vmatprep.subr.bf16.mxu0 %v314_v0 }
  0x42   :  { %226 = vmatpush3.bf16.msra.mxu0 %v225_v22 }
  0x43   :  { %227 = vmatprep.subr.bf16.mxu0 %v314_v0 }
  0x46   :  { %229 = vmatpush3.bf16.msra.mxu0 %v228_v25 }
  0x49   :  { %204 = vmatmul.mubr.f32.vlgmr.msra.gmra.mrb[0].mxu0 %v41_v26 }
 0x11c   :  { %v131_v28 = vpop.f32.mrb[0].mxu0 }
 0x11d   :  { %v132_v29 = vadd.f32 %v153_v27, %v131_v28  ;;  %v205_v30 = vpop.f32.mrb[1].mxu0 }
 0x11f   :  { %v135_v31 = vmax.f32 %v132_v29, 0.0 }
 0x121   :  { %136 = vst [vmem:[#allocation7] sm:$0xff] %v135_v31 }
 0x122   :  { %293 = shalt.err (!%p290_p6)
}
 0x123   :  { %s294_s16 = scalar_lea.hbm %s387_s3, 128 }
 0x124   :  { %p295_p7 = scmp.ne.s32.totalorder %s387_s3, %s294_s16  ;;  %p298_p8 = scmp.lt.u32.totalorder %s294_s16, %s387_s3 }
 0x126   :  { %p300_p9 = pnand %p298_p8, %p295_p7 }
 0x128   :  { %303 = shalt.err (!%p300_p9)
}
 0x129   :  { %146 = dma.vmem_to_hbm [thread:$0]  %s144_s12, 128, %s387_s3, [#allocation4]  }
 0x12a   :  { %308 = dma.done.wait [#allocation4], 128  }
 0x12b   :  { %309 = vsyncadd [#allocation4], 4294967168 }
 0x12c   :  { %150 = vsyncpa [#allocation3], 1 }
 0x12d   :  { %151 = vsyncpa [#allocation6], 1 }
 0x12e   :  { %152 = vsyncpa [#allocation4], 1 }

</bundles_post_ra>
